<compile_context>
chip_gen: v7x
topology: tpu7x:2x2x1
jax: 0.10.0
libtpu: 0.0.40
codegen_flags: <defaults>
</compile_context>

<pallas_src>
import functools

import jax
import jax.numpy as jnp
from jax.experimental import pallas as pl
from jax.experimental.pallas import tpu as pltpu

_EPS = 1e-5
_LANE = 128


def _round_up(x, m):
    return (x + m - 1) // m * m


def _full_spec(shape):
    # grid=() -> index_map takes no grid args; full-array block (exempt from (8,128) rule).
    return pl.BlockSpec(shape, lambda: (0,) * len(shape))


def _mlp_fused_kernel(*refs, num_hidden_layers, inv_n, matmul_dtype):
    """refs = (x, w_0..w_{L-1}, w_out, gb(2L,H), b_out(1,O), out)."""
    x_ref = refs[0]
    w_refs = refs[1:1 + num_hidden_layers]
    w_out_ref = refs[1 + num_hidden_layers]
    gb_ref = refs[2 + num_hidden_layers]
    b_out_ref = refs[3 + num_hidden_layers]
    out_ref = refs[4 + num_hidden_layers]

    h = x_ref[...]                      # already matmul_dtype (cast once in the wrapper)
    inv_n = jnp.float32(inv_n)

    for l in range(num_hidden_layers):
        # Linear (no bias: BatchNorm cancels it exactly).  MXU, f32 accumulation.
        z = jnp.dot(h, w_refs[l][...], preferred_element_type=jnp.float32)
        # BatchNorm1d (training mode): one pass of axis-0 reductions, f32 epilogue math.
        mean = jnp.sum(z, axis=0, keepdims=True) * inv_n
        mean_sq = jnp.sum(z * z, axis=0, keepdims=True) * inv_n
        var = jnp.maximum(mean_sq - mean * mean, 0.0)      # biased var, clamped >= 0
        inv_std = jax.lax.rsqrt(var + _EPS)                # EUP slot
        gamma = gb_ref[2 * l:2 * l + 1, :]                 # (1, H) static slices
        beta = gb_ref[2 * l + 1:2 * l + 2, :]
        scale = gamma * inv_std                            # (1, H)
        shift = beta - mean * scale                        # (1, H)
        # Fused BN + ReLU epilogue, cast straight to the matmul dtype for the next layer.
        h = jnp.maximum(z * scale + shift, 0.0).astype(matmul_dtype)

    out = jnp.dot(h, w_out_ref[...], preferred_element_type=jnp.float32) + b_out_ref[...]
    out_ref[...] = out.astype(out_ref.dtype)


def _fused_mlp_call(x_pad, weights, gb, b_out, num_hidden_layers):
    n = x_pad.shape[0]
    hid_pad = gb.shape[1]
    out_pad = b_out.shape[1]
    matmul_dtype = weights[0].dtype
    operands = (x_pad, *weights, gb, b_out)

    kernel = functools.partial(
        _mlp_fused_kernel,
        num_hidden_layers=num_hidden_layers,
        inv_n=1.0 / n,                  # true batch size (batch axis is never padded)
        matmul_dtype=matmul_dtype,
    )

    # VMEM budget: operands + output + kernel-internal z/h temporaries, capped at a
    # generation-aware fraction of physical VMEM (~48 MiB on v7x, ~96 MiB on v5e/v6e).
    operand_bytes = sum(int(a.size) * a.dtype.itemsize for a in operands)
    act_itemsize = 4 + jnp.dtype(matmul_dtype).itemsize    # z (f32) + h (matmul dtype)
    act_bytes = 2 * n * max(hid_pad, out_pad) * act_itemsize
    out_bytes = 2 * n * out_pad * 4
    need = operand_bytes + act_bytes + out_bytes + (2 << 20)
    try:
        cap = int(pltpu.get_tpu_info().vmem_capacity_bytes)
    except Exception:
        cap = 64 << 20
    usable = (cap * 3) // 4
    vmem_limit = int(min(max(need, 16 << 20), usable))

    # TODO(synk): for large batches, replace grid=() with an N-tiled two-pass BN pipeline
    # ("arbitrary" N axis accumulating sum/sum-sq, weights resident) and mark the N axis
    # "parallel" in dimension_semantics so v7x's 2 TensorCores are both used.
    return pl.pallas_call(
        kernel,
        out_shape=jax.ShapeDtypeStruct((n, out_pad), jnp.float32),
        grid=(),
        in_specs=[_full_spec(a.shape) for a in operands],
        out_specs=_full_spec((n, out_pad)),
        compiler_params=pltpu.CompilerParams(vmem_limit_bytes=vmem_limit),
    )(*operands)


def init_mlp_params(key, input_dim, hidden_dim, output_dim, num_hidden_layers=1):
    """PyTorch-equivalent shapes/init (Linear: U(-1/sqrt(fan_in), +); BN: gamma=1, beta=0)."""
    params = []
    d_in = input_dim
    for _ in range(num_hidden_layers):
        key, k1, k2 = jax.random.split(key, 3)
        bound = 1.0 / (d_in ** 0.5)
        w = jax.random.uniform(k1, (d_in, hidden_dim), jnp.float32, -bound, bound)
        b = jax.random.uniform(k2, (hidden_dim,), jnp.float32, -bound, bound)
        gamma = jnp.ones((hidden_dim,), jnp.float32)
        beta = jnp.zeros((hidden_dim,), jnp.float32)
        params.append(("hidden", w, b, gamma, beta))
        d_in = hidden_dim
    key, k1, k2 = jax.random.split(key, 3)
    bound = 1.0 / (hidden_dim ** 0.5)
    w_out = jax.random.uniform(k1, (hidden_dim, output_dim), jnp.float32, -bound, bound)
    b_out = jax.random.uniform(k2, (output_dim,), jnp.float32, -bound, bound)
    params.append(("out", w_out, b_out))
    return params


def pad_params(params, matmul_dtype=jnp.bfloat16):
    """Host-side, once: zero-pad feature dims to 128 lanes, cast weights to the matmul dtype,
    pack gamma/beta into one (2L, H_pad) f32 array, DROP hidden biases (cancelled by BN)."""
    hidden = [p for p in params if p[0] == "hidden"]
    _, w_out, b_out = params[-1]

    hid = hidden[0][1].shape[1]
    hid_pad = _round_up(hid, _LANE)

    weights = []
    gb_rows = []
    for _, w, _b, gamma, beta in hidden:
        d_in, d_out = w.shape
        p_in = _round_up(d_in, _LANE)
        weights.append(
            jnp.pad(w, ((0, p_in - d_in), (0, hid_pad - d_out))).astype(matmul_dtype))
        gb_rows.append(jnp.pad(gamma, (0, hid_pad - d_out)))   # 0-padding keeps padded chans 0
        gb_rows.append(jnp.pad(beta, (0, hid_pad - d_out)))

    d_in, d_out = w_out.shape
    p_in, out_pad = _round_up(d_in, _LANE), _round_up(d_out, _LANE)
    weights.append(
        jnp.pad(w_out, ((0, p_in - d_in), (0, out_pad - d_out))).astype(matmul_dtype))

    gb = jnp.stack(gb_rows, axis=0)                             # (2L, hid_pad) f32
    b_out_p = jnp.pad(b_out, (0, out_pad - d_out)).reshape(1, out_pad).astype(jnp.float32)
    return {"weights": tuple(weights), "gb": gb, "b_out": b_out_p}


@functools.partial(jax.jit, static_argnames=("num_hidden_layers", "output_dim"))
def mlp_forward(padded, x, *, num_hidden_layers, output_dim):
    weights, gb, b_out = padded["weights"], padded["gb"], padded["b_out"]
    n, d_in = x.shape
    d_in_pad = weights[0].shape[0]
    x_pad = jnp.pad(x, ((0, 0), (0, d_in_pad - d_in))).astype(weights[0].dtype)
    y_pad = _fused_mlp_call(x_pad, weights, gb, b_out, num_hidden_layers)
    return y_pad[:, :output_dim]


def _reference_forward(params, x):
    """Pure-JAX reference with exact PyTorch training-mode semantics (incl. hidden biases)."""
    h = x
    for layer in params:
        if layer[0] == "hidden":
            _, w, b, gamma, beta = layer
            h = h @ w + b
            mean = jnp.mean(h, axis=0, keepdims=True)
            var = jnp.mean((h - mean) ** 2, axis=0, keepdims=True)   # biased
            h = (h - mean) * jax.lax.rsqrt(var + _EPS) * gamma + beta
            h = jnp.maximum(h, 0.0)
        else:
            _, w, b = layer
            h = h @ w + b
    return h


if __name__ == "__main__":
    key = jax.random.PRNGKey(0)
    # Small demo shapes; hidden width lane-dense (128).  At batch=8 the kernel is
    # launch/DMA-overhead bound by construction (see review) — that is expected.
    batch, input_dim, hidden_dim, output_dim = 8, 16, 128, 8
    num_hidden_layers = 2

    kx, kp = jax.random.split(key)
    x = jax.random.normal(kx, (batch, input_dim), jnp.float32)
    params = init_mlp_params(kp, input_dim, hidden_dim, output_dim, num_hidden_layers)
    ref = _reference_forward(params, x)

    # f32 matmul path: near-exact match to the PyTorch-semantics reference.
    out_f32 = mlp_forward(pad_params(params, jnp.float32), x,
                          num_hidden_layers=num_hidden_layers, output_dim=output_dim)
    out_f32 = jax.block_until_ready(out_f32)
    assert out_f32.shape == (batch, output_dim)
    assert jnp.allclose(out_f32, ref, atol=2e-4, rtol=2e-4), \
        float(jnp.max(jnp.abs(out_f32 - ref)))

    # bf16-operand / f32-accumulation path (perf default on the MXU's native dtype).
    out_bf16 = mlp_forward(pad_params(params, jnp.bfloat16), x,
                           num_hidden_layers=num_hidden_layers, output_dim=output_dim)
    out_bf16 = jax.block_until_ready(out_bf16)
    assert out_bf16.shape == (batch, output_dim)
    assert jnp.allclose(out_bf16, ref, atol=6e-2, rtol=6e-2), \
        float(jnp.max(jnp.abs(out_bf16 - ref)))

    print("KERNEL_OK")
</pallas_src>

<mosaic_0001>
module attributes {stable_mosaic.version = 11 : i64} {
  func.func @_mlp_fused_kernel(%arg0: memref<8x128xf32, #tpu.memory_space<vmem>>, %arg1: memref<128x128xf32, #tpu.memory_space<vmem>>, %arg2: memref<128x128xf32, #tpu.memory_space<vmem>>, %arg3: memref<128x128xf32, #tpu.memory_space<vmem>>, %arg4: memref<4x128xf32, #tpu.memory_space<vmem>>, %arg5: memref<1x128xf32, #tpu.memory_space<vmem>>, %arg6: memref<8x128xf32, #tpu.memory_space<vmem>>) attributes {dimension_semantics = [], scalar_prefetch = 0 : i64, scratch_operands = 0 : i64, tpu.core_type = #tpu.core_type<tc>} {
    %c0 = arith.constant 0 : index
    %c0_0 = arith.constant 0 : index
    %0 = vector.load %arg0[%c0, %c0_0] : memref<8x128xf32, #tpu.memory_space<vmem>>, vector<8x128xf32>
    %c0_1 = arith.constant 0 : index
    %c0_2 = arith.constant 0 : index
    %1 = vector.load %arg1[%c0_1, %c0_2] : memref<128x128xf32, #tpu.memory_space<vmem>>, vector<128x128xf32>
    %cst = arith.constant dense<0.000000e+00> : vector<8x128xf32>
    %2 = tpu.matmul %0, %1, %cst {dimension_numbers = #tpu.dot_dimension_numbers<[1], [0], [0], [1], [0, 0, 1, 1], [], []>} : vector<8x128xf32>, vector<128x128xf32>, vector<8x128xf32> -> vector<8x128xf32>
    %cst_3 = arith.constant dense<0.000000e+00> : vector<128xf32>
    %3 = vector.multi_reduction <add>, %2, %cst_3 [0] : vector<8x128xf32> to vector<128xf32>
    %4 = vector.shape_cast %3 : vector<128xf32> to vector<1x128xf32>
    %cst_4 = arith.constant 1.250000e-01 : f32
    %5 = vector.broadcast %cst_4 : f32 to vector<1x128xf32>
    %6 = arith.mulf %4, %5 : vector<1x128xf32>
    %7 = arith.mulf %2, %2 : vector<8x128xf32>
    %cst_5 = arith.constant dense<0.000000e+00> : vector<128xf32>
    %8 = vector.multi_reduction <add>, %7, %cst_5 [0] : vector<8x128xf32> to vector<128xf32>
    %9 = vector.shape_cast %8 : vector<128xf32> to vector<1x128xf32>
    %cst_6 = arith.constant 1.250000e-01 : f32
    %10 = vector.broadcast %cst_6 : f32 to vector<1x128xf32>
    %11 = arith.mulf %9, %10 : vector<1x128xf32>
    %12 = arith.mulf %6, %6 : vector<1x128xf32>
    %13 = arith.subf %11, %12 : vector<1x128xf32>
    %cst_7 = arith.constant 0.000000e+00 : f32
    %14 = vector.broadcast %cst_7 : f32 to vector<1x128xf32>
    %15 = arith.maximumf %13, %14 : vector<1x128xf32>
    %cst_8 = arith.constant 9.99999974E-6 : f32
    %16 = vector.broadcast %cst_8 : f32 to vector<1x128xf32>
    %17 = arith.addf %15, %16 : vector<1x128xf32>
    %18 = math.rsqrt %17 : vector<1x128xf32>
    %c0_9 = arith.constant 0 : index
    %c0_10 = arith.constant 0 : index
    %19 = vector.load %arg4[%c0_9, %c0_10] : memref<4x128xf32, #tpu.memory_space<vmem>>, vector<1x128xf32>
    %c1 = arith.constant 1 : index
    %c0_11 = arith.constant 0 : index
    %20 = vector.load %arg4[%c1, %c0_11] : memref<4x128xf32, #tpu.memory_space<vmem>>, vector<1x128xf32>
    %21 = arith.mulf %19, %18 : vector<1x128xf32>
    %22 = arith.mulf %6, %21 : vector<1x128xf32>
    %23 = arith.subf %20, %22 : vector<1x128xf32>
    %24 = vector.broadcast %21 : vector<1x128xf32> to vector<8x128xf32>
    %25 = arith.mulf %2, %24 : vector<8x128xf32>
    %26 = vector.broadcast %23 : vector<1x128xf32> to vector<8x128xf32>
    %27 = arith.addf %25, %26 : vector<8x128xf32>
    %cst_12 = arith.constant 0.000000e+00 : f32
    %28 = vector.broadcast %cst_12 : f32 to vector<8x128xf32>
    %29 = arith.maximumf %27, %28 : vector<8x128xf32>
    %c0_13 = arith.constant 0 : index
    %c0_14 = arith.constant 0 : index
    %30 = vector.load %arg2[%c0_13, %c0_14] : memref<128x128xf32, #tpu.memory_space<vmem>>, vector<128x128xf32>
    %cst_15 = arith.constant dense<0.000000e+00> : vector<8x128xf32>
    %31 = tpu.matmul %29, %30, %cst_15 {dimension_numbers = #tpu.dot_dimension_numbers<[1], [0], [0], [1], [0, 0, 1, 1], [], []>} : vector<8x128xf32>, vector<128x128xf32>, vector<8x128xf32> -> vector<8x128xf32>
    %cst_16 = arith.constant dense<0.000000e+00> : vector<128xf32>
    %32 = vector.multi_reduction <add>, %31, %cst_16 [0] : vector<8x128xf32> to vector<128xf32>
    %33 = vector.shape_cast %32 : vector<128xf32> to vector<1x128xf32>
    %cst_17 = arith.constant 1.250000e-01 : f32
    %34 = vector.broadcast %cst_17 : f32 to vector<1x128xf32>
    %35 = arith.mulf %33, %34 : vector<1x128xf32>
    %36 = arith.mulf %31, %31 : vector<8x128xf32>
    %cst_18 = arith.constant dense<0.000000e+00> : vector<128xf32>
    %37 = vector.multi_reduction <add>, %36, %cst_18 [0] : vector<8x128xf32> to vector<128xf32>
    %38 = vector.shape_cast %37 : vector<128xf32> to vector<1x128xf32>
    %cst_19 = arith.constant 1.250000e-01 : f32
    %39 = vector.broadcast %cst_19 : f32 to vector<1x128xf32>
    %40 = arith.mulf %38, %39 : vector<1x128xf32>
    %41 = arith.mulf %35, %35 : vector<1x128xf32>
    %42 = arith.subf %40, %41 : vector<1x128xf32>
    %cst_20 = arith.constant 0.000000e+00 : f32
    %43 = vector.broadcast %cst_20 : f32 to vector<1x128xf32>
    %44 = arith.maximumf %42, %43 : vector<1x128xf32>
    %cst_21 = arith.constant 9.99999974E-6 : f32
    %45 = vector.broadcast %cst_21 : f32 to vector<1x128xf32>
    %46 = arith.addf %44, %45 : vector<1x128xf32>
    %47 = math.rsqrt %46 : vector<1x128xf32>
    %c2 = arith.constant 2 : index
    %c0_22 = arith.constant 0 : index
    %48 = vector.load %arg4[%c2, %c0_22] : memref<4x128xf32, #tpu.memory_space<vmem>>, vector<1x128xf32>
    %c3 = arith.constant 3 : index
    %c0_23 = arith.constant 0 : index
    %49 = vector.load %arg4[%c3, %c0_23] : memref<4x128xf32, #tpu.memory_space<vmem>>, vector<1x128xf32>
    %50 = arith.mulf %48, %47 : vector<1x128xf32>
    %51 = arith.mulf %35, %50 : vector<1x128xf32>
    %52 = arith.subf %49, %51 : vector<1x128xf32>
    %53 = vector.broadcast %50 : vector<1x128xf32> to vector<8x128xf32>
    %54 = arith.mulf %31, %53 : vector<8x128xf32>
    %55 = vector.broadcast %52 : vector<1x128xf32> to vector<8x128xf32>
    %56 = arith.addf %54, %55 : vector<8x128xf32>
    %cst_24 = arith.constant 0.000000e+00 : f32
    %57 = vector.broadcast %cst_24 : f32 to vector<8x128xf32>
    %58 = arith.maximumf %56, %57 : vector<8x128xf32>
    %c0_25 = arith.constant 0 : index
    %c0_26 = arith.constant 0 : index
    %59 = vector.load %arg3[%c0_25, %c0_26] : memref<128x128xf32, #tpu.memory_space<vmem>>, vector<128x128xf32>
    %cst_27 = arith.constant dense<0.000000e+00> : vector<8x128xf32>
    %60 = tpu.matmul %58, %59, %cst_27 {dimension_numbers = #tpu.dot_dimension_numbers<[1], [0], [0], [1], [0, 0, 1, 1], [], []>} : vector<8x128xf32>, vector<128x128xf32>, vector<8x128xf32> -> vector<8x128xf32>
    %c0_28 = arith.constant 0 : index
    %c0_29 = arith.constant 0 : index
    %61 = vector.load %arg5[%c0_28, %c0_29] : memref<1x128xf32, #tpu.memory_space<vmem>>, vector<1x128xf32>
    %62 = vector.broadcast %61 : vector<1x128xf32> to vector<8x128xf32>
    %63 = arith.addf %60, %62 : vector<8x128xf32>
    %c0_30 = arith.constant 0 : index
    %c0_31 = arith.constant 0 : index
    %64 = vector.load %arg6[%c0_30, %c0_31] : memref<8x128xf32, #tpu.memory_space<vmem>>, vector<8x128xf32>
    tpu.vector_store %arg6[%c0_30, %c0_31], %63 {strides = array<i32>} : memref<8x128xf32, #tpu.memory_space<vmem>>, vector<8x128xf32>,
    return
  }
}

</mosaic_0001>

<bundles_post_ra>
// kernel: mlp_forward.1
= control target key start
LH: loop header
LB: loop body
LE: loop exit
PB: predicated region body
PF: predicated region fallthrough
CT: control target
= control target key end

     0   :  { %11 = vsyncpa [#allocation3], 0  ;;  %s915_s0 = inlined_call_operand.vmem [shape: f32[8,128], index: 0, kind: input, shape index: {}]   ;;  %s916_s1 = inlined_call_operand.hbm [shape: f32[128,128], index: 1, kind: input, shape index: {}]   ;;  %s917_s2 = inlined_call_operand.hbm [shape: f32[128,128], index: 2, kind: input, shape index: {}]   ;;  %s918_s3 = inlined_call_operand.hbm [shape: f32[128,128], index: 3, kind: input, shape index: {}]   ;;  %s919_s4 = inlined_call_operand.vmem [shape: f32[4,128], index: 4, kind: input, shape index: {}]   ;;  %s920_s5 = inlined_call_operand.vmem [shape: f32[1,128], index: 5, kind: input, shape index: {}]   ;;  %s921_s6 = inlined_call_operand.hbm [shape: f32[8,128], index: 6, kind: output, shape index: {}]  }
   0x1   :  { %12 = vsyncpa [#allocation6], 0 }
   0x2   :  { %13 = vsyncpa [#allocation4], 0  ;;  %s756_s21 = smov [#allocation5]   ;;  %s757_s23 = smov [#allocation2]  }
   0x3   :  { %s33_s22 = sshll.u32 %s756_s21, 4  ;;  %s21_s24 = sshll.u32 %s757_s23, 4  ;;  %s34_s22 = int_to_ptr.vmem [resolvable:$true] %s33_s22  ;;  %s800_s24 = int_to_ptr.vmem [resolvable:$true] %s21_s24 }
   0x4   :  { %s662_s27 = scalar_lea.hbm %s917_s2, 2048 }
   0x5   :  { %p663_p0 = scmp.ne.s32.totalorder %s917_s2, %s662_s27  ;;  %p666_p1 = scmp.lt.u32.totalorder %s662_s27, %s917_s2 }
   0x7   :  { %p668_p2 = pnand %p666_p1, %p663_p0 }
   0x9   :  { %671 = shalt.err (!%p668_p2)
}
   0xa   :  { %s672_s8 = scalar_lea.vmem %s34_s22, 2048  ;;  %p677_p4 = scmp.lt.s32.totalorder %s34_s22, %s34_s22 }
   0xb   :  { %p673_p3 = scmp.ne.s32.totalorder %s34_s22, %s672_s8  ;;  %p678_p5 = scmp.lt.s32.totalorder %s672_s8, %s672_s8 }
   0xd   :  { %p679_p6 = por %p678_p5, %p677_p4 }
   0xf   :  { %p680_p7 = pnand %p679_p6, %p673_p3 }
  0x11   :  { %683 = shalt.err (!%p680_p7)
}
  0x12   :  { %s758_s9 = smov 128   ;;  %s759_s10 = smov 8  }
  0x13   :  { %39 = dma.hbm_to_vmem [thread:$0]  %s917_s2, 2048, %s34_s22, [#allocation6], %s758_s9, %s758_s9, %s759_s10  }
  0x14   :  { %s684_s15 = scalar_lea.hbm %s916_s1, 2048 }
  0x15   :  { %p685_p8 = scmp.ne.s32.totalorder %s916_s1, %s684_s15  ;;  %p688_p9 = scmp.lt.u32.totalorder %s684_s15, %s916_s1 }
  0x17   :  { %p690_p10 = pnand %p688_p9, %p685_p8 }
  0x19   :  { %693 = shalt.err (!%p690_p10)
}
  0x1a   :  { %s694_s20 = scalar_lea.vmem %s800_s24, 2048  ;;  %p699_p12 = scmp.lt.s32.totalorder %s800_s24, %s800_s24 }
  0x1b   :  { %p695_p11 = scmp.ne.s32.totalorder %s800_s24, %s694_s20  ;;  %p700_p13 = scmp.lt.s32.totalorder %s694_s20, %s694_s20 }
  0x1d   :  { %p701_p0 = por %p700_p13, %p699_p12 }
  0x1f   :  { %p702_p1 = pnand %p701_p0, %p695_p11 }
  0x21   :  { %705 = shalt.err (!%p702_p1)
}
  0x22   :  { %27 = dma.hbm_to_vmem [thread:$0]  %s916_s1, 2048, %s800_s24, [#allocation3], %s758_s9, %s758_s9, %s759_s10  }
  0x23   :  { %s760_s22 = smov [#allocation7]   ;;  %s706_s27 = scalar_lea.hbm %s918_s3, 2048 }
  0x24   :  { %s45_s23 = sshll.u32 %s760_s22, 4  ;;  %p707_p2 = scmp.ne.s32.totalorder %s918_s3, %s706_s27  ;;  %s46_s23 = int_to_ptr.vmem [resolvable:$true] %s45_s23 }
  0x25   :  { %p710_p3 = scmp.lt.u32.totalorder %s706_s27, %s918_s3 }
  0x27   :  { %p712_p4 = pnand %p710_p3, %p707_p2 }
  0x29   :  { %715 = shalt.err (!%p712_p4)
}
  0x2a   :  { %s716_s8 = scalar_lea.vmem %s46_s23, 2048  ;;  %p721_p6 = scmp.lt.s32.totalorder %s46_s23, %s46_s23 }
  0x2b   :  { %p717_p5 = scmp.ne.s32.totalorder %s46_s23, %s716_s8  ;;  %p722_p7 = scmp.lt.s32.totalorder %s716_s8, %s716_s8 }
  0x2d   :  { %p723_p8 = por %p722_p7, %p721_p6 }
  0x2f   :  { %p724_p9 = pnand %p723_p8, %p717_p5 }
  0x31   :  { %727 = shalt.err (!%p724_p9)
}
  0x32   :  { %51 = dma.hbm_to_vmem [thread:$0]  %s918_s3, 2048, %s46_s23, [#allocation6], %s758_s9, %s758_s9, %s759_s10  }
  0x33   :  { %750 = dma.done.wait [#allocation3], 2048  }
  0x34   :  { %751 = vsyncadd [#allocation3], 4294965248 }
  0x35   :  { %752 = dma.done.wait [#allocation6], 4096  }
  0x36   :  { %753 = vsyncadd [#allocation6], 4294963200  ;;  %v761_v0 = vmov 0.0|0.0   ;;  %vm762_vm0 = vmmov 0   ;;  %v763_v1 = vmov 0.0   ;;  %v66_v2 = vld [vmem:[#allocation2] sm:$0xff] }
  0x37   :  { %577 = vmatprep.subr.bf16.mxu0 %v761_v0  ;;  %504 = vmatprep.mubr.msk.f32.mxu0 %vm762_vm0, %v763_v1  ;;  %v67_v3 = vld [vmem:[#allocation2 + $0x8] sm:$0xff]  ;;  %v68_v4 = vld [vmem:[#allocation2 + $0x10] sm:$0xff]  ;;  %v69_v6 = vld [vmem:[#allocation2 + $0x18] sm:$0xff]  ;;  %s764_s19 = smov [#allocation8]  }
  0x38   :  { %601 = vmatprep.subr.bf16.mxu1 %v761_v0  ;;  %539 = vmatprep.mubr.msk.f32.mxu1 %vm762_vm0, %v763_v1  ;;  %v578_v5 = vpack.c.bf16 %v67_v3, %v66_v2  ;;  %v581_v7 = vpack.c.bf16 %v69_v6, %v68_v4  ;;  %v70_v8 = vld [vmem:[#allocation2 + $0x20] sm:$0xff]  ;;  %v71_v9 = vld [vmem:[#allocation2 + $0x28] sm:$0xff]  ;;  %v72_v11 = vld [vmem:[#allocation2 + $0x30] sm:$0xff]  ;;  %s410_s20 = sshll.u32 %s764_s19, 4  ;;  %s411_s20 = int_to_ptr.vmem [resolvable:$true] %s410_s20 }
  0x39   :  { %v584_v10 = vpack.c.bf16 %v71_v9, %v70_v8  ;;  %v73_v12 = vld [vmem:[#allocation2 + $0x38] sm:$0xff]  ;;  %v74_v14 = vld [vmem:[#allocation2 + $0x40] sm:$0xff]  ;;  %v75_v15 = vld [vmem:[#allocation2 + $0x48] sm:$0xff]  ;;  %v177_v9 = vlaneseq  ;;  %p733_p11 = scmp.lt.s32.totalorder %s411_s20, %s411_s20 }
  0x3a   :  { %579 = vmatpush3.bf16.msra.mxu0 %v578_v5  ;;  %v587_v13 = vpack.c.bf16 %v73_v12, %v72_v11  ;;  %v590_v16 = vpack.c.bf16 %v75_v15, %v74_v14  ;;  %v76_v17 = vld [vmem:[#allocation2 + $0x50] sm:$0xff]  ;;  %v77_v18 = vld [vmem:[#allocation2 + $0x58] sm:$0xff]  ;;  %v78_v20 = vld [vmem:[#allocation2 + $0x60] sm:$0xff] }
  0x3b   :  { %580 = vmatprep.subr.bf16.mxu0 %v761_v0  ;;  %v593_v19 = vpack.c.bf16 %v77_v18, %v76_v17  ;;  %v79_v21 = vld [vmem:[#allocation2 + $0x68] sm:$0xff]  ;;  %v80_v23 = vld [vmem:[#allocation2 + $0x70] sm:$0xff]  ;;  %v81_v24 = vld [vmem:[#allocation2 + $0x78] sm:$0xff] }
  0x3c   :  { %v596_v22 = vpack.c.bf16 %v79_v21, %v78_v20  ;;  %v599_v25 = vpack.c.bf16 %v81_v24, %v80_v23  ;;  %v65_v26 = vld [vmem:[%s915_s0] sm:$0xff]  ;;  %v189_v28 = vld [vmem:[#allocation5 + $0x8] sm:$0xff]  ;;  %v190_v30 = vld [vmem:[#allocation5 + $0x10] sm:$0xff] }
  0x3d   :  { %v188_v27 = vld [vmem:[#allocation5] sm:$0xff]  ;;  %v191_v31 = vld [vmem:[#allocation5 + $0x18] sm:$0xff]  ;;  %v193_v34 = vld [vmem:[#allocation5 + $0x28] sm:$0xff] }
  0x3e   :  { %582 = vmatpush3.bf16.msra.mxu0 %v581_v7  ;;  %v602_v29 = vpack.c.bf16 %v189_v28, %v188_v27  ;;  %v605_v32 = vpack.c.bf16 %v191_v31, %v190_v30  ;;  %v192_v33 = vld [vmem:[#allocation5 + $0x20] sm:$0xff]  ;;  %v194_v36 = vld [vmem:[#allocation5 + $0x30] sm:$0xff]  ;;  %v195_v37 = vld [vmem:[#allocation5 + $0x38] sm:$0xff] }
  0x3f   :  { %583 = vmatprep.subr.bf16.mxu0 %v761_v0  ;;  %v608_v35 = vpack.c.bf16 %v193_v34, %v192_v33  ;;  %v611_v38 = vpack.c.bf16 %v195_v37, %v194_v36  ;;  %v196_v39 = vld [vmem:[#allocation5 + $0x40] sm:$0xff]  ;;  %v197_v40 = vld [vmem:[#allocation5 + $0x48] sm:$0xff]  ;;  %v198_v42 = vld [vmem:[#allocation5 + $0x50] sm:$0xff] }
  0x40   :  { %603 = vmatpush3.bf16.msra.mxu1 %v602_v29  ;;  %v614_v41 = vpack.c.bf16 %v197_v40, %v196_v39  ;;  %v199_v43 = vld [vmem:[#allocation5 + $0x58] sm:$0xff]  ;;  %v200_v45 = vld [vmem:[#allocation5 + $0x60] sm:$0xff]  ;;  %v201_v46 = vld [vmem:[#allocation5 + $0x68] sm:$0xff] }
  0x41   :  { %604 = vmatprep.subr.bf16.mxu1 %v761_v0  ;;  %v617_v44 = vpack.c.bf16 %v199_v43, %v198_v42  ;;  %v620_v47 = vpack.c.bf16 %v201_v46, %v200_v45  ;;  %v202_v48 = vld [vmem:[#allocation5 + $0x70] sm:$0xff]  ;;  %v203_v49 = vld [vmem:[#allocation5 + $0x78] sm:$0xff]  ;;  %v172_v11 = vld [vmem:[%s919_s4] sm:$0x1] }
  0x42   :  { %585 = vmatpush3.bf16.msra.mxu0 %v584_v10  ;;  %v623_v50 = vpack.c.bf16 %v203_v49, %v202_v48  ;;  %v178_v10 = vshrl.u32 %v177_v9, 7  ;;  %v173_v15 = vld [vmem:[%s919_s4 + $0x1] sm:$0x1]  ;;  %v311_v24 = vld [vmem:[#allocation7 + $0x8] sm:$0xff]  ;;  %v313_v27 = vld [vmem:[#allocation7 + $0x18] sm:$0xff] }
  0x43   :  { %586 = vmatprep.subr.bf16.mxu0 %v761_v0  ;;  %v310_v23 = vld [vmem:[#allocation7] sm:$0xff]  ;;  %v315_v30 = vld [vmem:[#allocation7 + $0x28] sm:$0xff]  ;;  %v317_v33 = vld [vmem:[#allocation7 + $0x38] sm:$0xff] }
  0x44   :  { %606 = vmatpush3.bf16.msra.mxu1 %v605_v32  ;;  %v878_v12 = vsub.s32 0, %v178_v10  ;;  %v314_v29 = vld [vmem:[#allocation7 + $0x20] sm:$0xff]  ;;  %v316_v32 = vld [vmem:[#allocation7 + $0x30] sm:$0xff]  ;;  %v319_v36 = vld [vmem:[#allocation7 + $0x48] sm:$0xff] }
  0x45   :  { %607 = vmatprep.subr.bf16.mxu1 %v761_v0  ;;  %v632_v31 = vpack.c.bf16 %v315_v30, %v314_v29  ;;  %v635_v34 = vpack.c.bf16 %v317_v33, %v316_v32  ;;  %v321_v39 = vld [vmem:[#allocation7 + $0x58] sm:$0xff]  ;;  %v323_v42 = vld [vmem:[#allocation7 + $0x68] sm:$0xff] }
  0x46   :  { %588 = vmatpush3.bf16.msra.mxu0 %v587_v13  ;;  %v325_v45 = vld [vmem:[#allocation7 + $0x78] sm:$0xff] }
  0x47   :  { %589 = vmatprep.subr.bf16.mxu0 %v761_v0 }
  0x48   :  { %609 = vmatpush3.bf16.msra.mxu1 %v608_v35  ;;  %v318_v35 = vld [vmem:[#allocation7 + $0x40] sm:$0xff] }
  0x49   :  { %610 = vmatprep.subr.bf16.mxu1 %v761_v0  ;;  %v638_v37 = vpack.c.bf16 %v319_v36, %v318_v35 }
  0x4a   :  { %591 = vmatpush3.bf16.msra.mxu0 %v590_v16 }
  0x4b   :  { %592 = vmatprep.subr.bf16.mxu0 %v761_v0 }
  0x4c   :  { %612 = vmatpush3.bf16.msra.mxu1 %v611_v38  ;;  %v320_v38 = vld [vmem:[#allocation7 + $0x50] sm:$0xff] }
  0x4d   :  { %613 = vmatprep.subr.bf16.mxu1 %v761_v0  ;;  %v641_v40 = vpack.c.bf16 %v321_v39, %v320_v38 }
  0x4e   :  { %594 = vmatpush3.bf16.msra.mxu0 %v593_v19 }
  0x4f   :  { %595 = vmatprep.subr.bf16.mxu0 %v761_v0 }
  0x50   :  { %615 = vmatpush3.bf16.msra.mxu1 %v614_v41  ;;  %v322_v41 = vld [vmem:[#allocation7 + $0x60] sm:$0xff] }
  0x51   :  { %616 = vmatprep.subr.bf16.mxu1 %v761_v0  ;;  %v644_v43 = vpack.c.bf16 %v323_v42, %v322_v41 }
  0x52   :  { %597 = vmatpush3.bf16.msra.mxu0 %v596_v22 }
  0x53   :  { %598 = vmatprep.subr.bf16.mxu0 %v761_v0 }
  0x54   :  { %618 = vmatpush3.bf16.msra.mxu1 %v617_v44  ;;  %v324_v44 = vld [vmem:[#allocation7 + $0x70] sm:$0xff] }
  0x55   :  { %619 = vmatprep.subr.bf16.mxu1 %v761_v0  ;;  %v647_v46 = vpack.c.bf16 %v325_v45, %v324_v44 }
  0x56   :  { %600 = vmatpush3.bf16.msra.mxu0 %v599_v25  ;;  %v626_v25 = vpack.c.bf16 %v311_v24, %v310_v23 }
  0x57   :  { %625 = vmatprep.subr.bf16.mxu0 %v761_v0 }
  0x58   :  { %621 = vmatpush3.bf16.msra.mxu1 %v620_v47 }
  0x59   :  { %505 = vmatmul.mubr.f32.vlgmr.msra.gmra.mrb[0].mxu0 %v65_v26  ;;  %622 = vmatprep.subr.bf16.mxu1 %v761_v0  ;;  %v312_v26 = vld [vmem:[#allocation7 + $0x10] sm:$0xff] }
  0x5a   :  { %574 = vmatprep.mubr.msk.f32.mxu0 %vm762_vm0, %v763_v1  ;;  %627 = vmatpush3.bf16.msra.mxu0 %v626_v25  ;;  %v629_v28 = vpack.c.bf16 %v313_v27, %v312_v26 }
  0x5b   :  { %628 = vmatprep.subr.bf16.mxu0 %v761_v0 }
  0x5c   :  { %624 = vmatpush3.bf16.msra.mxu1 %v623_v50 }
  0x5e   :  { %630 = vmatpush3.bf16.msra.mxu0 %v629_v28 }
  0x5f   :  { %631 = vmatprep.subr.bf16.mxu0 %v761_v0 }
  0x62   :  { %633 = vmatpush3.bf16.msra.mxu0 %v632_v31 }
  0x63   :  { %634 = vmatprep.subr.bf16.mxu0 %v761_v0 }
  0x66   :  { %636 = vmatpush3.bf16.msra.mxu0 %v635_v34 }
  0x67   :  { %637 = vmatprep.subr.bf16.mxu0 %v761_v0 }
  0x6a   :  { %639 = vmatpush3.bf16.msra.mxu0 %v638_v37 }
  0x6b   :  { %640 = vmatprep.subr.bf16.mxu0 %v761_v0 }
  0x6e   :  { %642 = vmatpush3.bf16.msra.mxu0 %v641_v40 }
  0x6f   :  { %643 = vmatprep.subr.bf16.mxu0 %v761_v0 }
  0x72   :  { %645 = vmatpush3.bf16.msra.mxu0 %v644_v43 }
  0x73   :  { %646 = vmatprep.subr.bf16.mxu0 %v761_v0 }
  0x76   :  { %648 = vmatpush3.bf16.msra.mxu0 %v647_v46 }
 0x12c   :  { %v148_v51 = vpop.f32.mrb[0].mxu0 }
 0x12d   :  { %v152_v52 = vrot.slane %v148_v51, 4  ;;  %v159_v53 = vmul.f32 %v148_v51, %v148_v51  ;;  %v506_v54 = vpop.f32.mrb[1].mxu0 }
 0x12f   :  { %v153_v55 = vadd.f32 %v152_v52, %v148_v51  ;;  %v160_v56 = vrot.slane %v159_v53, 4 }
 0x131   :  { %v154_v57 = vrot.slane %v153_v55, 2  ;;  %v161_v58 = vadd.f32 %v160_v56, %v159_v53 }
 0x133   :  { %v155_v59 = vadd.f32 %v154_v57, %v153_v55  ;;  %v162_v60 = vrot.slane %v161_v58, 2 }
 0x135   :  { %v156_v61 = vrot.slane %v155_v59, 1  ;;  %v163_v62 = vadd.f32 %v162_v60, %v161_v58 }
 0x137   :  { %v157_v63 = vadd.f32 %v156_v61, %v155_v59  ;;  %v164_v1 = vrot.slane %v163_v62, 1 }
 0x139   :  { %v158_v2 = vmul.f32 0.125, %v157_v63  ;;  %v165_v3 = vadd.f32 %v164_v1, %v163_v62 }
 0x13b   :  { %v166_v4 = vmul.f32 0.125, %v165_v3  ;;  %v167_v5 = vmul.f32 %v158_v2, %v158_v2 }
 0x13d   :  { %v168_v6 = vsub.f32 %v166_v4, %v167_v5  ;;  %v294_v4 = vld [vmem:[%s919_s4 + $0x2] sm:$0x1] }
 0x13f   :  { %v169_v7 = vmax.f32 %v168_v6, 0.0 }
 0x141   :  { %v170_v8 = vadd.f32 1e-05, %v169_v7  ;;  %v295_v7 = vld [vmem:[%s919_s4 + $0x3] sm:$0x1]  ;;  %s728_s4 = scalar_lea.vmem %s411_s20, 128 }
 0x142   :  { %p729_p10 = scmp.ne.s32.totalorder %s411_s20, %s728_s4  ;;  %p734_p12 = scmp.lt.s32.totalorder %s728_s4, %s728_s4 }
 0x143   :  { %658 = vrsqrt.f32 %v170_v8 }
 0x144   :  { %p735_p13 = por %p734_p12, %p733_p11 }
 0x146   :  { %p736_p0 = pnand %p735_p13, %p729_p10 }
 0x14d   :  { %v659_v13 = vpop.eup %658 }
 0x14e   :  { %v174_v14 = vmul.f32 %v659_v13, %v172_v11 }
 0x150   :  { %v180_v16 = vrot.slane %v174_v14, %v878_v12  ;;  %v175_v17 = vmul.f32 %v174_v14, %v158_v2 }
 0x152   :  { %v176_v18 = vsub.f32 %v173_v15, %v175_v17  ;;  %v181_v19 = vmul.f32 %v180_v16, %v148_v51  ;;  %v420_v16 = vld [vmem:[%s920_s5] ss:$0 sm:$0xff] }
 0x154   :  { %v185_v20 = vrot.slane %v176_v18, %v878_v12 }
 0x156   :  { %v186_v21 = vadd.f32 %v185_v20, %v181_v19 }
 0x158   :  { %v187_v22 = vmax.f32 %v186_v21, 0.0 }
 0x15a   :  { %540 = vmatmul.mubr.f32.vlgmr.msra.gmra.mrb[0].mxu1 %v187_v22 }
 0x22d   :  { %v270_v47 = vpop.f32.mrb[0].mxu1 }
 0x22e   :  { %v274_v48 = vrot.slane %v270_v47, 4  ;;  %v281_v49 = vmul.f32 %v270_v47, %v270_v47  ;;  %v541_v50 = vpop.f32.mrb[1].mxu1 }
 0x230   :  { %v275_v51 = vadd.f32 %v274_v48, %v270_v47  ;;  %v282_v52 = vrot.slane %v281_v49, 4 }
 0x232   :  { %v276_v53 = vrot.slane %v275_v51, 2  ;;  %v283_v54 = vadd.f32 %v282_v52, %v281_v49 }
 0x234   :  { %v277_v55 = vadd.f32 %v276_v53, %v275_v51  ;;  %v284_v56 = vrot.slane %v283_v54, 2 }
 0x236   :  { %v278_v57 = vrot.slane %v277_v55, 1  ;;  %v285_v58 = vadd.f32 %v284_v56, %v283_v54 }
 0x238   :  { %v279_v59 = vadd.f32 %v278_v57, %v277_v55  ;;  %v286_v60 = vrot.slane %v285_v58, 1 }
 0x23a   :  { %v280_v61 = vmul.f32 0.125, %v279_v59  ;;  %v287_v0 = vadd.f32 %v286_v60, %v285_v58 }
 0x23c   :  { %v288_v62 = vmul.f32 0.125, %v287_v0  ;;  %v289_v63 = vmul.f32 %v280_v61, %v280_v61 }
 0x23e   :  { %v290_v1 = vsub.f32 %v288_v62, %v289_v63 }
 0x240   :  { %v291_v2 = vmax.f32 %v290_v1, 0.0 }
 0x242   :  { %v292_v3 = vadd.f32 1e-05, %v291_v2 }
 0x244   :  { %660 = vrsqrt.f32 %v292_v3 }
 0x24e   :  { %v661_v5 = vpop.eup %660 }
 0x24f   :  { %v296_v6 = vmul.f32 %v661_v5, %v294_v4 }
 0x251   :  { %v297_v8 = vmul.f32 %v296_v6, %v280_v61  ;;  %v302_v9 = vrot.slane %v296_v6, %v878_v12 }
 0x253   :  { %v298_v10 = vsub.f32 %v295_v7, %v297_v8  ;;  %v303_v11 = vmul.f32 %v302_v9, %v270_v47 }
 0x255   :  { %v307_v13 = vrot.slane %v298_v10, %v878_v12 }
 0x257   :  { %v308_v14 = vadd.f32 %v307_v13, %v303_v11 }
 0x259   :  { %v309_v15 = vmax.f32 %v308_v14, 0.0 }
 0x25b   :  { %575 = vmatmul.mubr.f32.vlgmr.msra.gmra.mrb[2].mxu0 %v309_v15 }
 0x32e   :  { %v399_v17 = vpop.f32.mrb[2].mxu0 }
 0x32f   :  { %v400_v18 = vadd.f32 %v420_v16, %v399_v17  ;;  %v576_v19 = vpop.f32.mrb[3].mxu0 }
 0x331   :  { %403 = vst [vmem:[#allocation8] sm:$0xff] %v400_v18 }
 0x332   :  { %739 = shalt.err (!%p736_p0)
}
 0x333   :  { %s740_s22 = scalar_lea.hbm %s921_s6, 128 }
 0x334   :  { %p741_p1 = scmp.ne.s32.totalorder %s921_s6, %s740_s22  ;;  %p744_p2 = scmp.lt.u32.totalorder %s740_s22, %s921_s6 }
 0x336   :  { %p746_p3 = pnand %p744_p2, %p741_p1 }
 0x338   :  { %749 = shalt.err (!%p746_p3)
}
 0x339   :  { %413 = dma.vmem_to_hbm [thread:$0]  %s411_s20, 128, %s921_s6, [#allocation4]  }
 0x33a   :  { %754 = dma.done.wait [#allocation4], 128  }
 0x33b   :  { %755 = vsyncadd [#allocation4], 4294967168 }
 0x33c   :  { %417 = vsyncpa [#allocation3], 1 }
 0x33d   :  { %418 = vsyncpa [#allocation6], 1 }
 0x33e   :  { %419 = vsyncpa [#allocation4], 1 }

</bundles_post_ra>
